<compile_context>
chip_gen: v6e
topology: v6e:2x2x1
jax: 0.10.0
libtpu: 0.0.40
codegen_flags: <defaults>
</compile_context>

<pallas_src>
import math

import jax
import jax.numpy as jnp
from jax.experimental import pallas as pl
from jax.experimental.pallas import tpu as pltpu

_LANE = 128


def _round_up(v, m):
    return ((v + m - 1) // m) * m


# ---------------------------------------------------------------------------
# Activations (mirror of getActivation; 'linear' -> identity, leakyRelu slope
# hard-coded to 0.2 exactly as in the PyTorch code).
# ---------------------------------------------------------------------------
def _apply_act(y, act_name, slope=0.2):
    if act_name == 'relu':
        return jnp.maximum(y, 0.0)
    if act_name == 'leakyRelu':
        return jnp.where(y >= 0.0, y, slope * y)
    if act_name == 'sigmoid':
        return jax.nn.sigmoid(y)
    if act_name == 'tanh':
        return jnp.tanh(y)
    # 'linear' -> no activation
    return y


# ---------------------------------------------------------------------------
# Fused whole-MLP kernel factory.
# refs layout: (x_ref, w_1, [b_1], w_2, [b_2], ..., w_L, [b_L], o_ref)
# ---------------------------------------------------------------------------
def _make_mlp_kernel(acts, slope, n_layer, has_bias):
    def kernel(*refs):
        x_ref = refs[0]
        o_ref = refs[-1]
        h = x_ref[...]
        idx = 1
        for i in range(n_layer):
            w_ref = refs[idx]
            idx += 1
            # Feed MXU-native (bf16) operands; accumulate in f32.  No f32 copy
            # of the weight is materialized in VMEM.
            y = jnp.dot(h.astype(w_ref.dtype), w_ref[...],
                        preferred_element_type=jnp.float32)
            if has_bias:
                b_ref = refs[idx]
                idx += 1
                y = y + b_ref[...].astype(jnp.float32)
            h = _apply_act(y, acts[i], slope)  # f32 on VPU/EUP
        o_ref[...] = h.astype(o_ref.dtype)

    return kernel


# ---------------------------------------------------------------------------
# JAX/Pallas port of the PyTorch `MLP` module.
# ---------------------------------------------------------------------------
class MLPPallas:
    def __init__(self, netData, key=None, param_dtype=jnp.bfloat16):
        self.netData = netData
        self.nLayer = netData['nLayer']
        self.fSize = netData['fSize']
        act = netData['act']
        if not isinstance(act, list):
            act = [act for _ in range(self.nLayer)]
        self.act = act
        try:
            self.BN = netData['BN']
        except Exception:
            self.BN = [False for _ in range(self.nLayer - 1)]
            self.BN.append(False)
        self.iSize = netData['iSize']
        self.bias = netData['bias'] if 'bias' in netData else False
        self.slope = 0.2  # getActivation's hard-coded leakyRelu default
        # bf16 weights: full MXU throughput on v5e/v6e/v7x (f32 accumulate kept).
        self.param_dtype = param_dtype
        # Single-buffer resident parameters when supported (saves VMEM on v7x).
        self._use_buffered = hasattr(pl, "Buffered")

        if key is None:
            key = jax.random.PRNGKey(0)
        self._build(key)

    # -- parameters ----------------------------------------------------------
    def _build(self, key):
        """Weights stored (in_pad, out_pad), lane-padded to 128; biases (1, out_pad)."""
        self._padded_sizes = [_round_up(f, _LANE) for f in self.fSize]
        self.weights = []
        self.biases = []
        in_actual = self.iSize
        in_pad = self.iSize  # input feature dim kept unpadded (full-array block)
        for i in range(self.nLayer):
            out_actual = self.fSize[i]
            out_pad = self._padded_sizes[i]
            bound = 1.0 / math.sqrt(in_actual)
            key, wk, bk = jax.random.split(key, 3)
            w_init = jax.random.uniform(
                wk, (in_actual, out_actual), dtype=jnp.float32,
                minval=-bound, maxval=bound)
            w = jnp.zeros((in_pad, out_pad), jnp.float32)
            w = w.at[:in_actual, :out_actual].set(w_init)
            self.weights.append(w.astype(self.param_dtype))
            if self.bias:
                b_init = jax.random.uniform(
                    bk, (1, out_actual), dtype=jnp.float32,
                    minval=-bound, maxval=bound)
                b = jnp.zeros((1, out_pad), jnp.float32)
                b = b.at[:, :out_actual].set(b_init)
                self.biases.append(b)  # bias add stays in f32
            else:
                self.biases.append(None)  # nn.Linear(bias=False): no parameter
            in_actual = out_actual
            in_pad = out_pad

    # -- forward ---------------------------------------------------------------
    def __call__(self, x, shortcut=None):
        # Reproduce the tuple-unwrapping of the PyTorch forward.
        if isinstance(x, tuple):
            x = x[0]
        return self._forward(x)

    def _forward(self, x):
        try:
            return self._pallas_forward(x, self._use_buffered)
        except Exception:
            if self._use_buffered:
                # Fallback if Buffered(1) parameter specs are not supported.
                self._use_buffered = False
                return self._pallas_forward(x, False)
            raise

    @staticmethod
    def _param_spec(shape, use_buffered):
        if use_buffered:
            return pl.BlockSpec(shape, lambda i: (0, 0),
                                pipeline_mode=pl.Buffered(1))
        return pl.BlockSpec(shape, lambda i: (0, 0))

    def _vmem_limit_bytes(self, x, tm, K, n_out_pad, use_buffered):
        xb = jnp.dtype(x.dtype).itemsize
        param_bytes = sum(int(w.size) * w.dtype.itemsize for w in self.weights)
        if self.bias:
            param_bytes += sum(int(b.size) * b.dtype.itemsize for b in self.biases)
        param_bytes *= (1 if use_buffered else 2)
        io_bytes = 2 * tm * K * xb + 2 * tm * n_out_pad * xb  # double-buffered I/O
        max_w = max([K] + list(self._padded_sizes))
        act_bytes = 3 * tm * max_w * 4                        # in-flight f32 temps
        need = param_bytes + io_bytes + act_bytes
        # 2x headroom, floor 32 MiB, cap at the v7x 64 MiB physical ceiling.
        return int(min(max(2 * need, 32 * 1024 * 1024), 64 * 1024 * 1024))

    def _pallas_forward(self, x, use_buffered):
        M, K = x.shape
        n_out = self.fSize[-1]
        n_out_pad = self._padded_sizes[-1]

        # Row tiling: one block for small batches; >=2 "parallel" steps when
        # M >= 256 (keeps both v7x TensorCores busy), tm multiple of 8, <=512.
        if M < 256:
            tm = M
        else:
            tm = min(512, _round_up(pl.cdiv(M, 2), 8))
        grid = (pl.cdiv(M, tm),)

        in_specs = [pl.BlockSpec((tm, K), lambda i: (i, 0))]
        flat_params = []
        for li in range(self.nLayer):
            w = self.weights[li]
            in_specs.append(self._param_spec(w.shape, use_buffered))
            flat_params.append(w)
            if self.bias:
                b = self.biases[li]
                in_specs.append(self._param_spec(b.shape, use_buffered))
                flat_params.append(b)

        out_spec = pl.BlockSpec((tm, n_out_pad), lambda i: (i, 0))

        kernel = _make_mlp_kernel(tuple(self.act), self.slope, self.nLayer,
                                  self.bias)

        out_padded = pl.pallas_call(
            kernel,
            out_shape=jax.ShapeDtypeStruct((M, n_out_pad), x.dtype),
            grid_spec=pl.GridSpec(
                grid=grid,
                in_specs=in_specs,
                out_specs=out_spec,
            ),
            compiler_params=pltpu.CompilerParams(
                dimension_semantics=("parallel",),
                vmem_limit_bytes=self._vmem_limit_bytes(
                    x, tm, K, n_out_pad, use_buffered),
            ),
        )(x, *flat_params)

        if n_out_pad != n_out:
            out_padded = out_padded[:, :n_out]
        return out_padded


# ---------------------------------------------------------------------------
# Demo / self-test
# ---------------------------------------------------------------------------
if __name__ == "__main__":
    key = jax.random.PRNGKey(0)
    k_param, k_in, k_in2 = jax.random.split(key, 3)

    # Small configuration consistent with the module: iSize=32, 3 layers.
    netData = {
        'iSize': 32,
        'nLayer': 3,
        'fSize': [64, 64, 32],
        'act': ['relu', 'tanh', 'linear'],
        'bias': True,
    }
    mlp = MLPPallas(netData, key=k_param)

    # Pure-JAX reference of the same forward pass (same bf16-weight math).
    def ref_forward(inp):
        h = inp
        for i in range(mlp.nLayer):
            w = mlp.weights[i]
            y = jnp.dot(h.astype(w.dtype), w, preferred_element_type=jnp.float32)
            if mlp.bias:
                y = y + mlp.biases[i]
            h = _apply_act(y, mlp.act[i], mlp.slope)
        return h[:, :mlp.fSize[-1]].astype(inp.dtype)

    # Case 1: small batch (single grid step).
    x = jax.random.normal(k_in, (8, 32), dtype=jnp.float32)
    ref = ref_forward(x)
    out = mlp(x)
    jax.block_until_ready(out)
    assert out.shape == (8, 32) and out.dtype == x.dtype
    assert bool(jnp.allclose(out, ref, atol=1e-4, rtol=1e-4))

    # Case 2: tuple input -> forward uses x[0].
    out_tuple = mlp((x, None))
    jax.block_until_ready(out_tuple)
    assert bool(jnp.allclose(out_tuple, ref, atol=1e-4, rtol=1e-4))

    # Case 3: larger batch -> multi-step "parallel" grid (exercises row tiling).
    x2 = jax.random.normal(k_in2, (512, 32), dtype=jnp.float32)
    ref2 = ref_forward(x2)
    out2 = mlp(x2)
    jax.block_until_ready(out2)
    assert out2.shape == (512, 32)
    assert bool(jnp.allclose(out2, ref2, atol=1e-4, rtol=1e-4))

    print("KERNEL_OK")
</pallas_src>

<mosaic_0001>
module attributes {stable_mosaic.version = 11 : i64} {
  func.func @kernel(%arg0: i32, %arg1: memref<8x32xf32, #tpu.memory_space<vmem>>, %arg2: memref<32x128xbf16, #tpu.memory_space<vmem>>, %arg3: memref<1x128xf32, #tpu.memory_space<vmem>>, %arg4: memref<128x128xbf16, #tpu.memory_space<vmem>>, %arg5: memref<1x128xf32, #tpu.memory_space<vmem>>, %arg6: memref<128x128xbf16, #tpu.memory_space<vmem>>, %arg7: memref<1x128xf32, #tpu.memory_space<vmem>>, %arg8: memref<8x128xf32, #tpu.memory_space<vmem>>) attributes {dimension_semantics = [#tpu.dimension_semantics<parallel>], iteration_bounds = array<i64: 1>, scalar_prefetch = 0 : i64, scratch_operands = 0 : i64, tpu.core_type = #tpu.core_type<tc>, window_params = [{transform_indices = @transform_0, window_bounds = array<i64: 8, 32>}, {pipeline_mode = #tpu.pipeline_mode<synchronous>, transform_indices = @transform_1, window_bounds = array<i64: 32, 128>}, {pipeline_mode = #tpu.pipeline_mode<synchronous>, transform_indices = @transform_2, window_bounds = array<i64: 1, 128>}, {pipeline_mode = #tpu.pipeline_mode<synchronous>, transform_indices = @transform_3, window_bounds = array<i64: 128, 128>}, {pipeline_mode = #tpu.pipeline_mode<synchronous>, transform_indices = @transform_4, window_bounds = array<i64: 1, 128>}, {pipeline_mode = #tpu.pipeline_mode<synchronous>, transform_indices = @transform_5, window_bounds = array<i64: 128, 128>}, {pipeline_mode = #tpu.pipeline_mode<synchronous>, transform_indices = @transform_6, window_bounds = array<i64: 1, 128>}, {transform_indices = @transform_7, window_bounds = array<i64: 8, 128>}]} {
    %c0 = arith.constant 0 : index
    %c0_0 = arith.constant 0 : index
    %0 = vector.load %arg1[%c0, %c0_0] : memref<8x32xf32, #tpu.memory_space<vmem>>, vector<8x32xf32>
    %1 = arith.truncf %0 : vector<8x32xf32> to vector<8x32xbf16>
    %c0_1 = arith.constant 0 : index
    %c0_2 = arith.constant 0 : index
    %2 = vector.load %arg2[%c0_1, %c0_2] : memref<32x128xbf16, #tpu.memory_space<vmem>>, vector<32x128xbf16>
    %cst = arith.constant dense<0.000000e+00> : vector<8x128xf32>
    %3 = tpu.matmul %1, %2, %cst {dimension_numbers = #tpu.dot_dimension_numbers<[1], [0], [0], [1], [0, 0, 1, 1], [], []>} : vector<8x32xbf16>, vector<32x128xbf16>, vector<8x128xf32> -> vector<8x128xf32>
    %c0_3 = arith.constant 0 : index
    %c0_4 = arith.constant 0 : index
    %4 = vector.load %arg3[%c0_3, %c0_4] : memref<1x128xf32, #tpu.memory_space<vmem>>, vector<1x128xf32>
    %5 = vector.broadcast %4 : vector<1x128xf32> to vector<8x128xf32>
    %6 = arith.addf %3, %5 : vector<8x128xf32>
    %cst_5 = arith.constant 0.000000e+00 : f32
    %7 = vector.broadcast %cst_5 : f32 to vector<8x128xf32>
    %8 = arith.maximumf %6, %7 : vector<8x128xf32>
    %9 = arith.truncf %8 : vector<8x128xf32> to vector<8x128xbf16>
    %c0_6 = arith.constant 0 : index
    %c0_7 = arith.constant 0 : index
    %10 = vector.load %arg4[%c0_6, %c0_7] : memref<128x128xbf16, #tpu.memory_space<vmem>>, vector<128x128xbf16>
    %cst_8 = arith.constant dense<0.000000e+00> : vector<8x128xf32>
    %11 = tpu.matmul %9, %10, %cst_8 {dimension_numbers = #tpu.dot_dimension_numbers<[1], [0], [0], [1], [0, 0, 1, 1], [], []>} : vector<8x128xbf16>, vector<128x128xbf16>, vector<8x128xf32> -> vector<8x128xf32>
    %c0_9 = arith.constant 0 : index
    %c0_10 = arith.constant 0 : index
    %12 = vector.load %arg5[%c0_9, %c0_10] : memref<1x128xf32, #tpu.memory_space<vmem>>, vector<1x128xf32>
    %13 = vector.broadcast %12 : vector<1x128xf32> to vector<8x128xf32>
    %14 = arith.addf %11, %13 : vector<8x128xf32>
    %15 = math.tanh %14 : vector<8x128xf32>
    %16 = arith.truncf %15 : vector<8x128xf32> to vector<8x128xbf16>
    %c0_11 = arith.constant 0 : index
    %c0_12 = arith.constant 0 : index
    %17 = vector.load %arg6[%c0_11, %c0_12] : memref<128x128xbf16, #tpu.memory_space<vmem>>, vector<128x128xbf16>
    %cst_13 = arith.constant dense<0.000000e+00> : vector<8x128xf32>
    %18 = tpu.matmul %16, %17, %cst_13 {dimension_numbers = #tpu.dot_dimension_numbers<[1], [0], [0], [1], [0, 0, 1, 1], [], []>} : vector<8x128xbf16>, vector<128x128xbf16>, vector<8x128xf32> -> vector<8x128xf32>
    %c0_14 = arith.constant 0 : index
    %c0_15 = arith.constant 0 : index
    %19 = vector.load %arg7[%c0_14, %c0_15] : memref<1x128xf32, #tpu.memory_space<vmem>>, vector<1x128xf32>
    %20 = vector.broadcast %19 : vector<1x128xf32> to vector<8x128xf32>
    %21 = arith.addf %18, %20 : vector<8x128xf32>
    %c0_16 = arith.constant 0 : index
    %c0_17 = arith.constant 0 : index
    %22 = vector.load %arg8[%c0_16, %c0_17] : memref<8x128xf32, #tpu.memory_space<vmem>>, vector<8x128xf32>
    tpu.vector_store %arg8[%c0_16, %c0_17], %21 {strides = array<i32>} : memref<8x128xf32, #tpu.memory_space<vmem>>, vector<8x128xf32>,
    return
  }
  func.func @transform_0(%arg0: i32) -> (i32, i32) {
    %c0_i32 = arith.constant 0 : i32
    %c0_i32_0 = arith.constant 0 : i32
    return %arg0, %c0_i32 : i32, i32
  }
  func.func @transform_1(%arg0: i32) -> (i32, i32) {
    %c0_i32 = arith.constant 0 : i32
    %c0_i32_0 = arith.constant 0 : i32
    %c0_i32_1 = arith.constant 0 : i32
    return %c0_i32, %c0_i32_0 : i32, i32
  }
  func.func @transform_2(%arg0: i32) -> (i32, i32) {
    %c0_i32 = arith.constant 0 : i32
    %c0_i32_0 = arith.constant 0 : i32
    %c0_i32_1 = arith.constant 0 : i32
    return %c0_i32, %c0_i32_0 : i32, i32
  }
  func.func @transform_3(%arg0: i32) -> (i32, i32) {
    %c0_i32 = arith.constant 0 : i32
    %c0_i32_0 = arith.constant 0 : i32
    %c0_i32_1 = arith.constant 0 : i32
    return %c0_i32, %c0_i32_0 : i32, i32
  }
  func.func @transform_4(%arg0: i32) -> (i32, i32) {
    %c0_i32 = arith.constant 0 : i32
    %c0_i32_0 = arith.constant 0 : i32
    %c0_i32_1 = arith.constant 0 : i32
    return %c0_i32, %c0_i32_0 : i32, i32
  }
  func.func @transform_5(%arg0: i32) -> (i32, i32) {
    %c0_i32 = arith.constant 0 : i32
    %c0_i32_0 = arith.constant 0 : i32
    %c0_i32_1 = arith.constant 0 : i32
    return %c0_i32, %c0_i32_0 : i32, i32
  }
  func.func @transform_6(%arg0: i32) -> (i32, i32) {
    %c0_i32 = arith.constant 0 : i32
    %c0_i32_0 = arith.constant 0 : i32
    %c0_i32_1 = arith.constant 0 : i32
    return %c0_i32, %c0_i32_0 : i32, i32
  }
  func.func @transform_7(%arg0: i32) -> (i32, i32) {
    %c0_i32 = arith.constant 0 : i32
    %c0_i32_0 = arith.constant 0 : i32
    return %arg0, %c0_i32 : i32, i32
  }
}

module attributes {stable_mosaic.version = 11 : i64} {
  func.func @kernel(%arg0: i32, %arg1: memref<8x32xf32, #tpu.memory_space<vmem>>, %arg2: memref<32x128xbf16, #tpu.memory_space<vmem>>, %arg3: memref<1x128xf32, #tpu.memory_space<vmem>>, %arg4: memref<128x128xbf16, #tpu.memory_space<vmem>>, %arg5: memref<1x128xf32, #tpu.memory_space<vmem>>, %arg6: memref<128x128xbf16, #tpu.memory_space<vmem>>, %arg7: memref<1x128xf32, #tpu.memory_space<vmem>>, %arg8: memref<8x128xf32, #tpu.memory_space<vmem>>) attributes {dimension_semantics = [#tpu.dimension_semantics<parallel>], iteration_bounds = array<i64: 1>, scalar_prefetch = 0 : i64, scratch_operands = 0 : i64, tpu.core_type = #tpu.core_type<tc>, window_params = [{transform_indices = @transform_0, window_bounds = array<i64: 8, 32>}, {pipeline_mode = #tpu.pipeline_mode<synchronous>, transform_indices = @transform_1, window_bounds = array<i64: 32, 128>}, {pipeline_mode = #tpu.pipeline_mode<synchronous>, transform_indices = @transform_2, window_bounds = array<i64: 1, 128>}, {pipeline_mode = #tpu.pipeline_mode<synchronous>, transform_indices = @transform_3, window_bounds = array<i64: 128, 128>}, {pipeline_mode = #tpu.pipeline_mode<synchronous>, transform_indices = @transform_4, window_bounds = array<i64: 1, 128>}, {pipeline_mode = #tpu.pipeline_mode<synchronous>, transform_indices = @transform_5, window_bounds = array<i64: 128, 128>}, {pipeline_mode = #tpu.pipeline_mode<synchronous>, transform_indices = @transform_6, window_bounds = array<i64: 1, 128>}, {transform_indices = @transform_7, window_bounds = array<i64: 8, 128>}]} {
    %c0 = arith.constant 0 : index
    %c0_0 = arith.constant 0 : index
    %0 = vector.load %arg1[%c0, %c0_0] : memref<8x32xf32, #tpu.memory_space<vmem>>, vector<8x32xf32>
    %1 = arith.truncf %0 : vector<8x32xf32> to vector<8x32xbf16>
    %c0_1 = arith.constant 0 : index
    %c0_2 = arith.constant 0 : index
    %2 = vector.load %arg2[%c0_1, %c0_2] : memref<32x128xbf16, #tpu.memory_space<vmem>>, vector<32x128xbf16>
    %cst = arith.constant dense<0.000000e+00> : vector<8x128xf32>
    %3 = tpu.matmul %1, %2, %cst {dimension_numbers = #tpu.dot_dimension_numbers<[1], [0], [0], [1], [0, 0, 1, 1], [], []>} : vector<8x32xbf16>, vector<32x128xbf16>, vector<8x128xf32> -> vector<8x128xf32>
    %c0_3 = arith.constant 0 : index
    %c0_4 = arith.constant 0 : index
    %4 = vector.load %arg3[%c0_3, %c0_4] : memref<1x128xf32, #tpu.memory_space<vmem>>, vector<1x128xf32>
    %5 = vector.broadcast %4 : vector<1x128xf32> to vector<8x128xf32>
    %6 = arith.addf %3, %5 : vector<8x128xf32>
    %cst_5 = arith.constant 0.000000e+00 : f32
    %7 = vector.broadcast %cst_5 : f32 to vector<8x128xf32>
    %8 = arith.maximumf %6, %7 : vector<8x128xf32>
    %9 = arith.truncf %8 : vector<8x128xf32> to vector<8x128xbf16>
    %c0_6 = arith.constant 0 : index
    %c0_7 = arith.constant 0 : index
    %10 = vector.load %arg4[%c0_6, %c0_7] : memref<128x128xbf16, #tpu.memory_space<vmem>>, vector<128x128xbf16>
    %cst_8 = arith.constant dense<0.000000e+00> : vector<8x128xf32>
    %11 = tpu.matmul %9, %10, %cst_8 {dimension_numbers = #tpu.dot_dimension_numbers<[1], [0], [0], [1], [0, 0, 1, 1], [], []>} : vector<8x128xbf16>, vector<128x128xbf16>, vector<8x128xf32> -> vector<8x128xf32>
    %c0_9 = arith.constant 0 : index
    %c0_10 = arith.constant 0 : index
    %12 = vector.load %arg5[%c0_9, %c0_10] : memref<1x128xf32, #tpu.memory_space<vmem>>, vector<1x128xf32>
    %13 = vector.broadcast %12 : vector<1x128xf32> to vector<8x128xf32>
    %14 = arith.addf %11, %13 : vector<8x128xf32>
    %15 = math.tanh %14 : vector<8x128xf32>
    %16 = arith.truncf %15 : vector<8x128xf32> to vector<8x128xbf16>
    %c0_11 = arith.constant 0 : index
    %c0_12 = arith.constant 0 : index
    %17 = vector.load %arg6[%c0_11, %c0_12] : memref<128x128xbf16, #tpu.memory_space<vmem>>, vector<128x128xbf16>
    %cst_13 = arith.constant dense<0.000000e+00> : vector<8x128xf32>
    %18 = tpu.matmul %16, %17, %cst_13 {dimension_numbers = #tpu.dot_dimension_numbers<[1], [0], [0], [1], [0, 0, 1, 1], [], []>} : vector<8x128xbf16>, vector<128x128xbf16>, vector<8x128xf32> -> vector<8x128xf32>
    %c0_14 = arith.constant 0 : index
    %c0_15 = arith.constant 0 : index
    %19 = vector.load %arg7[%c0_14, %c0_15] : memref<1x128xf32, #tpu.memory_space<vmem>>, vector<1x128xf32>
    %20 = vector.broadcast %19 : vector<1x128xf32> to vector<8x128xf32>
    %21 = arith.addf %18, %20 : vector<8x128xf32>
    %c0_16 = arith.constant 0 : index
    %c0_17 = arith.constant 0 : index
    %22 = vector.load %arg8[%c0_16, %c0_17] : memref<8x128xf32, #tpu.memory_space<vmem>>, vector<8x128xf32>
    tpu.vector_store %arg8[%c0_16, %c0_17], %21 {strides = array<i32>} : memref<8x128xf32, #tpu.memory_space<vmem>>, vector<8x128xf32>,
    return
  }
  func.func @transform_0(%arg0: i32) -> (i32, i32) {
    %c0_i32 = arith.constant 0 : i32
    %c0_i32_0 = arith.constant 0 : i32
    return %arg0, %c0_i32 : i32, i32
  }
  func.func @transform_1(%arg0: i32) -> (i32, i32) {
    %c0_i32 = arith.constant 0 : i32
    %c0_i32_0 = arith.constant 0 : i32
    %c0_i32_1 = arith.constant 0 : i32
    return %c0_i32, %c0_i32_0 : i32, i32
  }
  func.func @transform_2(%arg0: i32) -> (i32, i32) {
    %c0_i32 = arith.constant 0 : i32
    %c0_i32_0 = arith.constant 0 : i32
    %c0_i32_1 = arith.constant 0 : i32
    return %c0_i32, %c0_i32_0 : i32, i32
  }
  func.func @transform_3(%arg0: i32) -> (i32, i32) {
    %c0_i32 = arith.constant 0 : i32
    %c0_i32_0 = arith.constant 0 : i32
    %c0_i32_1 = arith.constant 0 : i32
    return %c0_i32, %c0_i32_0 : i32, i32
  }
  func.func @transform_4(%arg0: i32) -> (i32, i32) {
    %c0_i32 = arith.constant 0 : i32
    %c0_i32_0 = arith.constant 0 : i32
    %c0_i32_1 = arith.constant 0 : i32
    return %c0_i32, %c0_i32_0 : i32, i32
  }
  func.func @transform_5(%arg0: i32) -> (i32, i32) {
    %c0_i32 = arith.constant 0 : i32
    %c0_i32_0 = arith.constant 0 : i32
    %c0_i32_1 = arith.constant 0 : i32
    return %c0_i32, %c0_i32_0 : i32, i32
  }
  func.func @transform_6(%arg0: i32) -> (i32, i32) {
    %c0_i32 = arith.constant 0 : i32
    %c0_i32_0 = arith.constant 0 : i32
    %c0_i32_1 = arith.constant 0 : i32
    return %c0_i32, %c0_i32_0 : i32, i32
  }
  func.func @transform_7(%arg0: i32) -> (i32, i32) {
    %c0_i32 = arith.constant 0 : i32
    %c0_i32_0 = arith.constant 0 : i32
    return %arg0, %c0_i32 : i32, i32
  }
}

</mosaic_0001>

<bundles_post_ra>
// kernel: tpu_custom_call.1
= control target key start
LH: loop header
LB: loop body
LE: loop exit
PB: predicated region body
PF: predicated region fallthrough
CT: control target
= control target key end

     0   :  { %12 = vsyncpa [#allocation3], 0  ;;  %s728_s0 = inlined_call_operand.hbm [shape: f32[8,32], index: 0, kind: input, shape index: {}]   ;;  %s729_s1 = inlined_call_operand.hbm [shape: bf16[32,128], index: 1, kind: input, shape index: {}]   ;;  %s730_s2 = inlined_call_operand.vmem [shape: f32[1,128], index: 2, kind: input, shape index: {}]   ;;  %s731_s3 = inlined_call_operand.hbm [shape: bf16[128,128], index: 3, kind: input, shape index: {}]   ;;  %s732_s4 = inlined_call_operand.vmem [shape: f32[1,128], index: 4, kind: input, shape index: {}]   ;;  %s733_s5 = inlined_call_operand.hbm [shape: bf16[128,128], index: 5, kind: input, shape index: {}]   ;;  %s734_s6 = inlined_call_operand.vmem [shape: f32[1,128], index: 6, kind: input, shape index: {}]   ;;  %s735_s7 = inlined_call_operand.hbm [shape: f32[8,128], index: 7, kind: output, shape index: {}]  }
   0x1   :  { %13 = vsyncpa [#allocation6], 0 }
   0x2   :  { %14 = vsyncpa [#allocation9], 0 }
   0x3   :  { %15 = vsyncpa [#allocation4], 0  ;;  %s622_s24 = smov [#allocation5]  }
   0x4   :  { %s31_s25 = sshll.u32 %s622_s24, 4  ;;  %s32_s25 = int_to_ptr.vmem [resolvable:$true] %s31_s25 }
   0x5   :  { %s522_s26 = scalar_lea.vmem %s32_s25, 256  ;;  %p527_p1 = scmp.lt.s32.totalorder %s32_s25, %s32_s25 }
   0x6   :  { %p523_p0 = scmp.ne.s32.totalorder %s32_s25, %s522_s26  ;;  %p528_p2 = scmp.lt.s32.totalorder %s522_s26, %s522_s26 }
   0x8   :  { %p529_p3 = por %p528_p2, %p527_p1 }
   0xa   :  { %p530_p4 = pnand %p529_p3, %p523_p0 }
   0xc   :  { %533 = shalt.err (!%p530_p4)
}
   0xd   :  { %s623_s27 = smov 64   ;;  %s624_s28 = smov 4  }
   0xe   :  { %37 = dma.hbm_to_vmem [thread:$0]  %s729_s1, 256, %s32_s25, [#allocation6], %s623_s27, %s623_s27, %s624_s28  }
   0xf   :  { %s625_s8 = smov [#allocation2]   ;;  %s626_s10 = smov [#allocation7]  }
  0x10   :  { %s22_s9 = sshll.u32 %s625_s8, 4  ;;  %s45_s11 = sshll.u32 %s626_s10, 4  ;;  %s23_s9 = int_to_ptr.vmem [resolvable:$true] %s22_s9  ;;  %s46_s11 = int_to_ptr.vmem [resolvable:$true] %s45_s11 }
  0x11   :  { %s542_s12 = scalar_lea.vmem %s23_s9, 128  ;;  %p547_p6 = scmp.lt.s32.totalorder %s23_s9, %s23_s9 }
  0x12   :  { %p543_p5 = scmp.ne.s32.totalorder %s23_s9, %s542_s12  ;;  %p548_p7 = scmp.lt.s32.totalorder %s542_s12, %s542_s12 }
  0x14   :  { %p549_p8 = por %p548_p7, %p547_p6 }
  0x16   :  { %p550_p9 = pnand %p549_p8, %p543_p5 }
  0x18   :  { %553 = shalt.err (!%p550_p9)
}
  0x19   :  { %25 = dma.hbm_to_vmem [thread:$0]  %s728_s0, 128, %s23_s9, [#allocation3]  }
  0x1a   :  { %s562_s15 = scalar_lea.vmem %s46_s11, 1024  ;;  %p567_p11 = scmp.lt.s32.totalorder %s46_s11, %s46_s11 }
  0x1b   :  { %p563_p10 = scmp.ne.s32.totalorder %s46_s11, %s562_s15  ;;  %p568_p12 = scmp.lt.s32.totalorder %s562_s15, %s562_s15 }
  0x1d   :  { %p569_p13 = por %p568_p12, %p567_p11 }
  0x1f   :  { %p570_p0 = pnand %p569_p13, %p563_p10 }
  0x21   :  { %573 = shalt.err (!%p570_p0)
}
  0x22   :  { %51 = dma.hbm_to_vmem [thread:$0]  %s731_s3, 1024, %s46_s11, [#allocation6], %s623_s27, %s623_s27, %s624_s28  }
  0x23   :  { %s627_s17 = smov [#allocation8]  }
  0x24   :  { %s59_s18 = sshll.u32 %s627_s17, 4  ;;  %s60_s18 = int_to_ptr.vmem [resolvable:$true] %s59_s18 }
  0x25   :  { %s582_s19 = scalar_lea.vmem %s60_s18, 1024  ;;  %p587_p2 = scmp.lt.s32.totalorder %s60_s18, %s60_s18 }
  0x26   :  { %p583_p1 = scmp.ne.s32.totalorder %s60_s18, %s582_s19  ;;  %p588_p3 = scmp.lt.s32.totalorder %s582_s19, %s582_s19 }
  0x28   :  { %p589_p4 = por %p588_p3, %p587_p2 }
  0x2a   :  { %p590_p5 = pnand %p589_p4, %p583_p1 }
  0x2c   :  { %593 = shalt.err (!%p590_p5)
}
  0x2d   :  { %65 = dma.hbm_to_vmem [thread:$0]  %s733_s5, 1024, %s60_s18, [#allocation9], %s623_s27, %s623_s27, %s624_s28  }
  0x2e   :  { %614 = dma.done.wait [#allocation3], 128  }
  0x2f   :  { %615 = vsyncadd [#allocation3], 4294967168 }
  0x30   :  { %616 = dma.done.wait [#allocation6], 1280  }
  0x31   :  { %617 = vsyncadd [#allocation6], 4294966016 }
  0x32   :  { %618 = dma.done.wait [#allocation9], 1024  }
  0x33   :  { %619 = vsyncadd [#allocation9], 4294966272  ;;  %v628_v0 = vmov 0.0   ;;  %vm629_vm0 = vmmov 0   ;;  %v494_v1 = vld [vmem:[#allocation5 + $0x8] sm:$0xff]   ;;  %v495_v2 = vld [vmem:[#allocation5] sm:$0xff]  }
  0x34   :  { %437 = vmatprep.subr.bf16.mxu0 %v628_v0  ;;  %441 = vmatprep.mubr.msk.bf16.mxu0 %vm629_vm0, %v628_v0  ;;  %v81_v3 = vld [vmem:[#allocation2] sm:$0xff]  ;;  %v496_v4 = vld [vmem:[#allocation7 + $0x38] sm:$0xff]   ;;  %v497_v6 = vld [vmem:[#allocation7 + $0x30] sm:$0xff]   ;;  %vm106_vm1 = vcmask 261120   ;;  %s630_s24 = smov [#allocation10]  }
  0x35   :  { %445 = vmatprep.subr.bf16.mxu1 %v628_v0  ;;  %461 = vmatprep.mubr.msk.bf16.mxu1 %vm629_vm0, %v628_v0  ;;  %v82_v5 = vpack.c.bf16 %v81_v3, %v81_v3  ;;  %v498_v7 = vld [vmem:[#allocation7 + $0x28] sm:$0xff]   ;;  %v499_v8 = vld [vmem:[#allocation7 + $0x20] sm:$0xff]   ;;  %v500_v9 = vld [vmem:[#allocation7 + $0x18] sm:$0xff]   ;;  %s383_s25 = sshll.u32 %s630_s24, 4  ;;  %s384_s25 = int_to_ptr.vmem [resolvable:$true] %s383_s25 }
  0x36   :  { %438 = vmatpush3.bf16.msra.mxu0 %v494_v1  ;;  %446 = vmatpush3.bf16.msra.mxu1 %v496_v4  ;;  %v501_v10 = vld [vmem:[#allocation7 + $0x10] sm:$0xff]   ;;  %v502_v11 = vld [vmem:[#allocation7 + $0x8] sm:$0xff]   ;;  %v503_v12 = vld [vmem:[#allocation7] sm:$0xff]   ;;  %p599_p7 = scmp.lt.s32.totalorder %s384_s25, %s384_s25 }
  0x37   :  { %439 = vmatprep.subr.bf16.mxu0 %v628_v0  ;;  %447 = vmatprep.subr.bf16.mxu1 %v628_v0  ;;  %v504_v13 = vld [vmem:[#allocation8 + $0x38] sm:$0xff]   ;;  %v505_v14 = vld [vmem:[#allocation8 + $0x30] sm:$0xff]   ;;  %v506_v15 = vld [vmem:[#allocation8 + $0x28] sm:$0xff]  }
  0x38   :  { %v394_v16 = vld [vmem:[%s730_s2] ss:$0 sm:$0xff]  ;;  %v507_v24 = vld [vmem:[#allocation8 + $0x20] sm:$0xff]   ;;  %v508_v25 = vld [vmem:[#allocation8 + $0x18] sm:$0xff]  }
  0x39   :  { %v509_v26 = vld [vmem:[#allocation8 + $0x10] sm:$0xff]   ;;  %v510_v27 = vld [vmem:[#allocation8 + $0x8] sm:$0xff]   ;;  %v511_v28 = vld [vmem:[#allocation8] sm:$0xff]  }
  0x3a   :  { %440 = vmatpush3.bf16.msra.mxu0 %v495_v2  ;;  %448 = vmatpush3.bf16.msra.mxu1 %v497_v6  ;;  %v398_v29 = vld [vmem:[%s732_s4] ss:$0 sm:$0xff]  ;;  %s594_s4 = scalar_lea.vmem %s384_s25, 128 }
  0x3b   :  { %465 = vmatprep.subr.bf16.mxu0 %v628_v0  ;;  %449 = vmatprep.subr.bf16.mxu1 %v628_v0  ;;  %v407_v37 = vld [vmem:[%s734_s6] ss:$0 sm:$0xff]  ;;  %p595_p6 = scmp.ne.s32.totalorder %s384_s25, %s594_s4  ;;  %p600_p8 = scmp.lt.s32.totalorder %s594_s4, %s594_s4 }
  0x3d   :  { %442 = vmatmul.mubr.msk.bf16.vlgmr.msra.gmra.mxu0 %vm106_vm1, %v82_v5  ;;  %p601_p9 = por %p600_p8, %p599_p7 }
  0x3e   :  { %481 = vmatprep.mubr.msk.bf16.mxu0 %vm629_vm0, %v628_v0  ;;  %450 = vmatpush3.bf16.msra.mxu1 %v498_v7 }
  0x3f   :  { %451 = vmatprep.subr.bf16.mxu1 %v628_v0  ;;  %466 = vmatpush3.bf16.msra.mxu0 %v504_v13  ;;  %p602_p10 = pnand %p601_p9, %p595_p6 }
  0x40   :  { %467 = vmatprep.subr.bf16.mxu0 %v628_v0 }
  0x42   :  { %452 = vmatpush3.bf16.msra.mxu1 %v499_v8 }
  0x43   :  { %453 = vmatprep.subr.bf16.mxu1 %v628_v0  ;;  %468 = vmatpush3.bf16.msra.mxu0 %v505_v14 }
  0x44   :  { %469 = vmatprep.subr.bf16.mxu0 %v628_v0 }
  0x46   :  { %454 = vmatpush3.bf16.msra.mxu1 %v500_v9 }
  0x47   :  { %455 = vmatprep.subr.bf16.mxu1 %v628_v0  ;;  %470 = vmatpush3.bf16.msra.mxu0 %v506_v15 }
  0x48   :  { %471 = vmatprep.subr.bf16.mxu0 %v628_v0 }
  0x4a   :  { %456 = vmatpush3.bf16.msra.mxu1 %v501_v10 }
  0x4b   :  { %457 = vmatprep.subr.bf16.mxu1 %v628_v0  ;;  %472 = vmatpush3.bf16.msra.mxu0 %v507_v24 }
  0x4c   :  { %473 = vmatprep.subr.bf16.mxu0 %v628_v0 }
  0x4e   :  { %458 = vmatpush3.bf16.msra.mxu1 %v502_v11 }
  0x4f   :  { %459 = vmatprep.subr.bf16.mxu1 %v628_v0  ;;  %474 = vmatpush3.bf16.msra.mxu0 %v508_v25 }
  0x50   :  { %475 = vmatprep.subr.bf16.mxu0 %v628_v0 }
  0x52   :  { %460 = vmatpush3.bf16.msra.mxu1 %v503_v12 }
  0x53   :  { %476 = vmatpush3.bf16.msra.mxu0 %v509_v26 }
  0x54   :  { %477 = vmatprep.subr.bf16.mxu0 %v628_v0 }
  0x57   :  { %478 = vmatpush3.bf16.msra.mxu0 %v510_v27 }
  0x58   :  { %479 = vmatprep.subr.bf16.mxu0 %v628_v0 }
  0x5b   :  { %480 = vmatpush3.bf16.msra.mxu0 %v511_v28 }
  0xfd   :  { %v144_v17 = vpop.f32.mrf.mxu0 }
  0xfe   :  { %v145_v18 = vadd.f32 %v394_v16, %v144_v17 }
  0xff   :  { %v443_v19 = vpop.f32.mrf.mxu0 }
 0x100   :  { %v150_v20 = vmax.f32 %v145_v18, 0.0 }
 0x101   :  { %v147_v21 = vpop.f32.mrf.mxu0 }
 0x102   :  { %v151_v22 = vpack.c.bf16 %v150_v20, %v150_v20 }
 0x103   :  { %v444_v23 = vpop.f32.mrf.mxu0 }
 0x104   :  { %462 = vmatmul.mubr.bf16.vlgmr.msra.gmra.mxu1 %v151_v22 }
 0x1c4   :  { %v257_v30 = vpop.f32.mrf.mxu1 }
 0x1c5   :  { %v258_v31 = vadd.f32 %v398_v29, %v257_v30 }
 0x1c6   :  { %v463_v32 = vpop.f32.mrf.mxu1 }
 0x1c7   :  { %512 = vtanh.f32 %v258_v31 }
 0x1c8   :  { %v260_v33 = vpop.f32.mrf.mxu1 }
 0x1ca   :  { %v464_v34 = vpop.f32.mrf.mxu1 }
 0x1d4   :  { %v513_v35 = vpop.eup %512 }
 0x1d5   :  { %v264_v36 = vpack.c.bf16 %v513_v35, %v513_v35 }
 0x1d7   :  { %482 = vmatmul.mubr.bf16.vlgmr.msra.gmra.mxu0 %v264_v36 }
 0x297   :  { %v370_v38 = vpop.f32.mrf.mxu0 }
 0x298   :  { %v371_v39 = vadd.f32 %v407_v37, %v370_v38 }
 0x299   :  { %v483_v40 = vpop.f32.mrf.mxu0 }
 0x29a   :  { %376 = vst [vmem:[#allocation10] sm:$0xff] %v371_v39 }
 0x29b   :  { %v373_v41 = vpop.f32.mrf.mxu0 }
 0x29c   :  { %605 = shalt.err (!%p602_p10)
}
 0x29d   :  { %386 = dma.vmem_to_hbm [thread:$0]  %s384_s25, 128, %s735_s7, [#allocation4]   ;;  %v484_v42 = vpop.f32.mrf.mxu0 }
 0x29e   :  { %620 = dma.done.wait [#allocation4], 128  }
 0x29f   :  { %621 = vsyncadd [#allocation4], 4294967168 }
 0x2a0   :  { %390 = vsyncpa [#allocation3], 1 }
 0x2a1   :  { %391 = vsyncpa [#allocation6], 1 }
 0x2a2   :  { %392 = vsyncpa [#allocation9], 1 }
 0x2a3   :  { %393 = vsyncpa [#allocation4], 1 }

// kernel: tpu_custom_call.1
= control target key start
LH: loop header
LB: loop body
LE: loop exit
PB: predicated region body
PF: predicated region fallthrough
CT: control target
= control target key end

     0   :  { %12 = vsyncpa [#allocation3], 0  ;;  %s728_s0 = inlined_call_operand.hbm [shape: f32[8,32], index: 0, kind: input, shape index: {}]   ;;  %s729_s1 = inlined_call_operand.hbm [shape: bf16[32,128], index: 1, kind: input, shape index: {}]   ;;  %s730_s2 = inlined_call_operand.vmem [shape: f32[1,128], index: 2, kind: input, shape index: {}]   ;;  %s731_s3 = inlined_call_operand.hbm [shape: bf16[128,128], index: 3, kind: input, shape index: {}]   ;;  %s732_s4 = inlined_call_operand.vmem [shape: f32[1,128], index: 4, kind: input, shape index: {}]   ;;  %s733_s5 = inlined_call_operand.hbm [shape: bf16[128,128], index: 5, kind: input, shape index: {}]   ;;  %s734_s6 = inlined_call_operand.vmem [shape: f32[1,128], index: 6, kind: input, shape index: {}]   ;;  %s735_s7 = inlined_call_operand.hbm [shape: f32[8,128], index: 7, kind: output, shape index: {}]  }
   0x1   :  { %13 = vsyncpa [#allocation6], 0 }
   0x2   :  { %14 = vsyncpa [#allocation9], 0 }
   0x3   :  { %15 = vsyncpa [#allocation4], 0  ;;  %s622_s24 = smov [#allocation5]  }
   0x4   :  { %s31_s25 = sshll.u32 %s622_s24, 4  ;;  %s32_s25 = int_to_ptr.vmem [resolvable:$true] %s31_s25 }
   0x5   :  { %s522_s26 = scalar_lea.vmem %s32_s25, 256  ;;  %p527_p1 = scmp.lt.s32.totalorder %s32_s25, %s32_s25 }
   0x6   :  { %p523_p0 = scmp.ne.s32.totalorder %s32_s25, %s522_s26  ;;  %p528_p2 = scmp.lt.s32.totalorder %s522_s26, %s522_s26 }
   0x8   :  { %p529_p3 = por %p528_p2, %p527_p1 }
   0xa   :  { %p530_p4 = pnand %p529_p3, %p523_p0 }
   0xc   :  { %533 = shalt.err (!%p530_p4)
}
   0xd   :  { %s623_s27 = smov 64   ;;  %s624_s28 = smov 4  }
   0xe   :  { %37 = dma.hbm_to_vmem [thread:$0]  %s729_s1, 256, %s32_s25, [#allocation6], %s623_s27, %s623_s27, %s624_s28  }
   0xf   :  { %s625_s8 = smov [#allocation2]   ;;  %s626_s10 = smov [#allocation7]  }
  0x10   :  { %s22_s9 = sshll.u32 %s625_s8, 4  ;;  %s45_s11 = sshll.u32 %s626_s10, 4  ;;  %s23_s9 = int_to_ptr.vmem [resolvable:$true] %s22_s9  ;;  %s46_s11 = int_to_ptr.vmem [resolvable:$true] %s45_s11 }
  0x11   :  { %s542_s12 = scalar_lea.vmem %s23_s9, 128  ;;  %p547_p6 = scmp.lt.s32.totalorder %s23_s9, %s23_s9 }
  0x12   :  { %p543_p5 = scmp.ne.s32.totalorder %s23_s9, %s542_s12  ;;  %p548_p7 = scmp.lt.s32.totalorder %s542_s12, %s542_s12 }
  0x14   :  { %p549_p8 = por %p548_p7, %p547_p6 }
  0x16   :  { %p550_p9 = pnand %p549_p8, %p543_p5 }
  0x18   :  { %553 = shalt.err (!%p550_p9)
}
  0x19   :  { %25 = dma.hbm_to_vmem [thread:$0]  %s728_s0, 128, %s23_s9, [#allocation3]  }
  0x1a   :  { %s562_s15 = scalar_lea.vmem %s46_s11, 1024  ;;  %p567_p11 = scmp.lt.s32.totalorder %s46_s11, %s46_s11 }
  0x1b   :  { %p563_p10 = scmp.ne.s32.totalorder %s46_s11, %s562_s15  ;;  %p568_p12 = scmp.lt.s32.totalorder %s562_s15, %s562_s15 }
  0x1d   :  { %p569_p13 = por %p568_p12, %p567_p11 }
  0x1f   :  { %p570_p0 = pnand %p569_p13, %p563_p10 }
  0x21   :  { %573 = shalt.err (!%p570_p0)
}
  0x22   :  { %51 = dma.hbm_to_vmem [thread:$0]  %s731_s3, 1024, %s46_s11, [#allocation6], %s623_s27, %s623_s27, %s624_s28  }
  0x23   :  { %s627_s17 = smov [#allocation8]  }
  0x24   :  { %s59_s18 = sshll.u32 %s627_s17, 4  ;;  %s60_s18 = int_to_ptr.vmem [resolvable:$true] %s59_s18 }
  0x25   :  { %s582_s19 = scalar_lea.vmem %s60_s18, 1024  ;;  %p587_p2 = scmp.lt.s32.totalorder %s60_s18, %s60_s18 }
  0x26   :  { %p583_p1 = scmp.ne.s32.totalorder %s60_s18, %s582_s19  ;;  %p588_p3 = scmp.lt.s32.totalorder %s582_s19, %s582_s19 }
  0x28   :  { %p589_p4 = por %p588_p3, %p587_p2 }
  0x2a   :  { %p590_p5 = pnand %p589_p4, %p583_p1 }
  0x2c   :  { %593 = shalt.err (!%p590_p5)
}
  0x2d   :  { %65 = dma.hbm_to_vmem [thread:$0]  %s733_s5, 1024, %s60_s18, [#allocation9], %s623_s27, %s623_s27, %s624_s28  }
  0x2e   :  { %614 = dma.done.wait [#allocation3], 128  }
  0x2f   :  { %615 = vsyncadd [#allocation3], 4294967168 }
  0x30   :  { %616 = dma.done.wait [#allocation6], 1280  }
  0x31   :  { %617 = vsyncadd [#allocation6], 4294966016 }
  0x32   :  { %618 = dma.done.wait [#allocation9], 1024  }
  0x33   :  { %619 = vsyncadd [#allocation9], 4294966272  ;;  %v628_v0 = vmov 0.0   ;;  %vm629_vm0 = vmmov 0   ;;  %v494_v1 = vld [vmem:[#allocation5 + $0x8] sm:$0xff]   ;;  %v495_v2 = vld [vmem:[#allocation5] sm:$0xff]  }
  0x34   :  { %437 = vmatprep.subr.bf16.mxu0 %v628_v0  ;;  %441 = vmatprep.mubr.msk.bf16.mxu0 %vm629_vm0, %v628_v0  ;;  %v81_v3 = vld [vmem:[#allocation2] sm:$0xff]  ;;  %v496_v4 = vld [vmem:[#allocation7 + $0x38] sm:$0xff]   ;;  %v497_v6 = vld [vmem:[#allocation7 + $0x30] sm:$0xff]   ;;  %vm106_vm1 = vcmask 261120   ;;  %s630_s24 = smov [#allocation10]  }
  0x35   :  { %445 = vmatprep.subr.bf16.mxu1 %v628_v0  ;;  %461 = vmatprep.mubr.msk.bf16.mxu1 %vm629_vm0, %v628_v0  ;;  %v82_v5 = vpack.c.bf16 %v81_v3, %v81_v3  ;;  %v498_v7 = vld [vmem:[#allocation7 + $0x28] sm:$0xff]   ;;  %v499_v8 = vld [vmem:[#allocation7 + $0x20] sm:$0xff]   ;;  %v500_v9 = vld [vmem:[#allocation7 + $0x18] sm:$0xff]   ;;  %s383_s25 = sshll.u32 %s630_s24, 4  ;;  %s384_s25 = int_to_ptr.vmem [resolvable:$true] %s383_s25 }
  0x36   :  { %438 = vmatpush3.bf16.msra.mxu0 %v494_v1  ;;  %446 = vmatpush3.bf16.msra.mxu1 %v496_v4  ;;  %v501_v10 = vld [vmem:[#allocation7 + $0x10] sm:$0xff]   ;;  %v502_v11 = vld [vmem:[#allocation7 + $0x8] sm:$0xff]   ;;  %v503_v12 = vld [vmem:[#allocation7] sm:$0xff]   ;;  %p599_p7 = scmp.lt.s32.totalorder %s384_s25, %s384_s25 }
  0x37   :  { %439 = vmatprep.subr.bf16.mxu0 %v628_v0  ;;  %447 = vmatprep.subr.bf16.mxu1 %v628_v0  ;;  %v504_v13 = vld [vmem:[#allocation8 + $0x38] sm:$0xff]   ;;  %v505_v14 = vld [vmem:[#allocation8 + $0x30] sm:$0xff]   ;;  %v506_v15 = vld [vmem:[#allocation8 + $0x28] sm:$0xff]  }
  0x38   :  { %v394_v16 = vld [vmem:[%s730_s2] ss:$0 sm:$0xff]  ;;  %v507_v24 = vld [vmem:[#allocation8 + $0x20] sm:$0xff]   ;;  %v508_v25 = vld [vmem:[#allocation8 + $0x18] sm:$0xff]  }
  0x39   :  { %v509_v26 = vld [vmem:[#allocation8 + $0x10] sm:$0xff]   ;;  %v510_v27 = vld [vmem:[#allocation8 + $0x8] sm:$0xff]   ;;  %v511_v28 = vld [vmem:[#allocation8] sm:$0xff]  }
  0x3a   :  { %440 = vmatpush3.bf16.msra.mxu0 %v495_v2  ;;  %448 = vmatpush3.bf16.msra.mxu1 %v497_v6  ;;  %v398_v29 = vld [vmem:[%s732_s4] ss:$0 sm:$0xff]  ;;  %s594_s4 = scalar_lea.vmem %s384_s25, 128 }
  0x3b   :  { %465 = vmatprep.subr.bf16.mxu0 %v628_v0  ;;  %449 = vmatprep.subr.bf16.mxu1 %v628_v0  ;;  %v407_v37 = vld [vmem:[%s734_s6] ss:$0 sm:$0xff]  ;;  %p595_p6 = scmp.ne.s32.totalorder %s384_s25, %s594_s4  ;;  %p600_p8 = scmp.lt.s32.totalorder %s594_s4, %s594_s4 }
  0x3d   :  { %442 = vmatmul.mubr.msk.bf16.vlgmr.msra.gmra.mxu0 %vm106_vm1, %v82_v5  ;;  %p601_p9 = por %p600_p8, %p599_p7 }
  0x3e   :  { %481 = vmatprep.mubr.msk.bf16.mxu0 %vm629_vm0, %v628_v0  ;;  %450 = vmatpush3.bf16.msra.mxu1 %v498_v7 }
  0x3f   :  { %451 = vmatprep.subr.bf16.mxu1 %v628_v0  ;;  %466 = vmatpush3.bf16.msra.mxu0 %v504_v13  ;;  %p602_p10 = pnand %p601_p9, %p595_p6 }
  0x40   :  { %467 = vmatprep.subr.bf16.mxu0 %v628_v0 }
  0x42   :  { %452 = vmatpush3.bf16.msra.mxu1 %v499_v8 }
  0x43   :  { %453 = vmatprep.subr.bf16.mxu1 %v628_v0  ;;  %468 = vmatpush3.bf16.msra.mxu0 %v505_v14 }
  0x44   :  { %469 = vmatprep.subr.bf16.mxu0 %v628_v0 }
  0x46   :  { %454 = vmatpush3.bf16.msra.mxu1 %v500_v9 }
  0x47   :  { %455 = vmatprep.subr.bf16.mxu1 %v628_v0  ;;  %470 = vmatpush3.bf16.msra.mxu0 %v506_v15 }
  0x48   :  { %471 = vmatprep.subr.bf16.mxu0 %v628_v0 }
  0x4a   :  { %456 = vmatpush3.bf16.msra.mxu1 %v501_v10 }
  0x4b   :  { %457 = vmatprep.subr.bf16.mxu1 %v628_v0  ;;  %472 = vmatpush3.bf16.msra.mxu0 %v507_v24 }
  0x4c   :  { %473 = vmatprep.subr.bf16.mxu0 %v628_v0 }
  0x4e   :  { %458 = vmatpush3.bf16.msra.mxu1 %v502_v11 }
  0x4f   :  { %459 = vmatprep.subr.bf16.mxu1 %v628_v0  ;;  %474 = vmatpush3.bf16.msra.mxu0 %v508_v25 }
  0x50   :  { %475 = vmatprep.subr.bf16.mxu0 %v628_v0 }
  0x52   :  { %460 = vmatpush3.bf16.msra.mxu1 %v503_v12 }
  0x53   :  { %476 = vmatpush3.bf16.msra.mxu0 %v509_v26 }
  0x54   :  { %477 = vmatprep.subr.bf16.mxu0 %v628_v0 }
  0x57   :  { %478 = vmatpush3.bf16.msra.mxu0 %v510_v27 }
  0x58   :  { %479 = vmatprep.subr.bf16.mxu0 %v628_v0 }
  0x5b   :  { %480 = vmatpush3.bf16.msra.mxu0 %v511_v28 }
  0xfd   :  { %v144_v17 = vpop.f32.mrf.mxu0 }
  0xfe   :  { %v145_v18 = vadd.f32 %v394_v16, %v144_v17 }
  0xff   :  { %v443_v19 = vpop.f32.mrf.mxu0 }
 0x100   :  { %v150_v20 = vmax.f32 %v145_v18, 0.0 }
 0x101   :  { %v147_v21 = vpop.f32.mrf.mxu0 }
 0x102   :  { %v151_v22 = vpack.c.bf16 %v150_v20, %v150_v20 }
 0x103   :  { %v444_v23 = vpop.f32.mrf.mxu0 }
 0x104   :  { %462 = vmatmul.mubr.bf16.vlgmr.msra.gmra.mxu1 %v151_v22 }
 0x1c4   :  { %v257_v30 = vpop.f32.mrf.mxu1 }
 0x1c5   :  { %v258_v31 = vadd.f32 %v398_v29, %v257_v30 }
 0x1c6   :  { %v463_v32 = vpop.f32.mrf.mxu1 }
 0x1c7   :  { %512 = vtanh.f32 %v258_v31 }
 0x1c8   :  { %v260_v33 = vpop.f32.mrf.mxu1 }
 0x1ca   :  { %v464_v34 = vpop.f32.mrf.mxu1 }
 0x1d4   :  { %v513_v35 = vpop.eup %512 }
 0x1d5   :  { %v264_v36 = vpack.c.bf16 %v513_v35, %v513_v35 }
 0x1d7   :  { %482 = vmatmul.mubr.bf16.vlgmr.msra.gmra.mxu0 %v264_v36 }
 0x297   :  { %v370_v38 = vpop.f32.mrf.mxu0 }
 0x298   :  { %v371_v39 = vadd.f32 %v407_v37, %v370_v38 }
 0x299   :  { %v483_v40 = vpop.f32.mrf.mxu0 }
 0x29a   :  { %376 = vst [vmem:[#allocation10] sm:$0xff] %v371_v39 }
 0x29b   :  { %v373_v41 = vpop.f32.mrf.mxu0 }
 0x29c   :  { %605 = shalt.err (!%p602_p10)
}
 0x29d   :  { %386 = dma.vmem_to_hbm [thread:$0]  %s384_s25, 128, %s735_s7, [#allocation4]   ;;  %v484_v42 = vpop.f32.mrf.mxu0 }
 0x29e   :  { %620 = dma.done.wait [#allocation4], 128  }
 0x29f   :  { %621 = vsyncadd [#allocation4], 4294967168 }
 0x2a0   :  { %390 = vsyncpa [#allocation3], 1 }
 0x2a1   :  { %391 = vsyncpa [#allocation6], 1 }
 0x2a2   :  { %392 = vsyncpa [#allocation9], 1 }
 0x2a3   :  { %393 = vsyncpa [#allocation4], 1 }

</bundles_post_ra>
